<compile_context>
chip_gen: v7x
topology: tpu7x:2x2x1
jax: 0.10.0
libtpu: 0.0.40
codegen_flags: <defaults>
</compile_context>

<pallas_src>
import functools
import math

import jax
import jax.numpy as jnp
from jax.experimental import pallas as pl
from jax.experimental.pallas import tpu as pltpu


def _round_up(x: int, m: int) -> int:
    return ((x + m - 1) // m) * m


def _cdiv(a: int, b: int) -> int:
    return (a + b - 1) // b


def _head_kernel(x_ref, w1_ref, b1_ref, w2_ref, b2_ref, out_ref, *, mxu_dtype):
    # Linear 1 on the MXU (bf16 operands by default, f32 accumulation).  The cast
    # of the f32 inputs happens here on the VPU, which is free filler under the MXU.
    h = jnp.dot(x_ref[...].astype(mxu_dtype), w1_ref[...].astype(mxu_dtype),
                preferred_element_type=jnp.float32)
    h = jnp.maximum(h + b1_ref[...], 0.0)          # bias + ReLU stay in f32
    # Dropout(p=0.0) is the identity -> no-op.
    y = jnp.dot(h.astype(mxu_dtype), w2_ref[...].astype(mxu_dtype),
                preferred_element_type=jnp.float32)
    y = y + b2_ref[...]
    out_ref[...] = y.astype(out_ref.dtype)


def _head_loss_kernel(x_ref, w1_ref, b1_ref, w2_ref, b2_ref, t_ref,
                      out_ref, part_ref, *,
                      mxu_dtype, tb, n_valid, inv_denom, need_row_mask):
    i = pl.program_id(0)

    h = jnp.dot(x_ref[...].astype(mxu_dtype), w1_ref[...].astype(mxu_dtype),
                preferred_element_type=jnp.float32)
    h = jnp.maximum(h + b1_ref[...], 0.0)
    y = jnp.dot(h.astype(mxu_dtype), w2_ref[...].astype(mxu_dtype),
                preferred_element_type=jnp.float32)
    y = y + b2_ref[...]
    out_ref[...] = y.astype(out_ref.dtype)

    # Fused MSE partial sum (VPU/XLU work hiding under MXU slack).  The last batch
    # tile may be partial: its out-of-bounds rows hold unspecified data, so they
    # are excluded with a select (jnp.where), never by multiplication.
    diff = y - t_ref[...].astype(jnp.float32)
    if need_row_mask:
        rows_left = n_valid - i * tb
        row_ids = jax.lax.broadcasted_iota(jnp.int32, diff.shape, 0)
        diff = jnp.where(row_ids < rows_left, diff, 0.0)
    sq = diff * diff
    partial = jnp.sum(jnp.sum(sq, axis=1, keepdims=True), axis=0, keepdims=True)
    # One private, already-scaled (8,128) lane-dense block per grid step -> no
    # cross-step accumulator, so the batch axis can stay "parallel" (v7x dual-TC).
    part_ref[...] = jnp.broadcast_to(partial * inv_denom, part_ref.shape)


def _choose_batch_tile(batch: int, tb_max: int, min_tiles: int) -> int:
    """Balanced batch tile: >= min_tiles tiles (v7x dual-TC), <= ~tb_max rows,
    minimal padded rows on the last tile, multiple of 8 sublanes."""
    n_tiles = max(min_tiles, _cdiv(batch, tb_max))
    tb = _round_up(_cdiv(batch, n_tiles), 8)
    return max(8, min(tb, _round_up(tb_max, 8)))


def _vmem_limit_bytes(single_buffer_block_bytes) -> int:
    # Every block is double-buffered by default; 2x headroom covers in-kernel f32
    # intermediates and bf16 cast copies.  Floor at 32 MiB (<= physical on every
    # generation, >= every scoped default incl. v5e's 16 MiB), cap at 128 MiB.
    need = 2 * sum(single_buffer_block_bytes)
    return int(min(128 * 1024 * 1024, max(32 * 1024 * 1024, 2 * need)))


def sequence_regression_head(pooled_output, w1, b1, w2, b2, targets=None, *,
                             dropout=0.0, tb_max=512, min_batch_tiles=2,
                             mxu_dtype=jnp.bfloat16):
    """Forward pass of SequenceRegressionHead.

    pooled_output: [B, in_dim]
    w1: [in_dim, hid_dim] (transposed vs. torch), b1: [hid_dim]
    w2: [hid_dim, out_dim], b2: [out_dim]
    targets: optional [B, out_dim]
    Returns (logits,) or ((mse_loss, metrics), logits) if targets is given.

    NOTE: matmul operands are rounded to `mxu_dtype` (bf16 by default) with f32
    accumulation; pass mxu_dtype=jnp.float32 for torch-exact f32 logits/loss.
    """
    if dropout != 0.0:
        # TODO(synk): training-mode Dropout(p>0) would need pltpu.prng_seed /
        # prng_random_bits masking in-kernel; p=0.0 (the module default) is identity.
        raise NotImplementedError("dropout > 0 not implemented in the Pallas head")

    B, in_dim = pooled_output.shape
    hid_dim = w1.shape[1]
    out_dim = w2.shape[1]
    out_dtype = pooled_output.dtype

    tb = _choose_batch_tile(B, tb_max, min_batch_tiles)
    n_tiles = _cdiv(B, tb)

    # Biases as (1, dim) rows (metadata-only reshape) so they broadcast in-kernel.
    b1_2d = b1.reshape(1, hid_dim)
    b2_2d = b2.reshape(1, out_dim)

    # Activations / outputs are tiled over the batch; weights and biases map to a
    # constant block index so they stay resident in VMEM (DMA'd once per call).
    # TODO(synk): mark the resident specs pipeline_mode=pl.Buffered(1) once the
    # top-level pallas_call pipeline supports single-buffered operands, to halve
    # their VMEM footprint for large hidden sizes (matters on v7x's 64 MiB VMEM).
    x_spec = pl.BlockSpec((tb, in_dim), lambda i: (i, 0))
    w1_spec = pl.BlockSpec((in_dim, hid_dim), lambda i: (0, 0))
    b1_spec = pl.BlockSpec((1, hid_dim), lambda i: (0, 0))
    w2_spec = pl.BlockSpec((hid_dim, out_dim), lambda i: (0, 0))
    b2_spec = pl.BlockSpec((1, out_dim), lambda i: (0, 0))
    o_spec = pl.BlockSpec((tb, out_dim), lambda i: (i, 0))

    def _blk_bytes(r, c, dtype):
        return _round_up(r, 8) * _round_up(c, 128) * jnp.dtype(dtype).itemsize

    blocks = [
        _blk_bytes(tb, in_dim, pooled_output.dtype),
        _blk_bytes(in_dim, hid_dim, w1.dtype),
        _blk_bytes(1, hid_dim, b1.dtype),
        _blk_bytes(hid_dim, out_dim, w2.dtype),
        _blk_bytes(1, out_dim, b2.dtype),
        _blk_bytes(tb, out_dim, out_dtype),
    ]

    flops = 2 * B * (in_dim * hid_dim + hid_dim * out_dim)
    base_bytes = (pooled_output.nbytes + w1.nbytes + b1.nbytes + w2.nbytes
                  + b2.nbytes + B * out_dim * jnp.dtype(out_dtype).itemsize)

    if targets is None:
        kernel = functools.partial(_head_kernel, mxu_dtype=mxu_dtype)
        logits = pl.pallas_call(
            kernel,
            out_shape=jax.ShapeDtypeStruct((B, out_dim), out_dtype),
            grid_spec=pltpu.PrefetchScalarGridSpec(
                num_scalar_prefetch=0,
                grid=(n_tiles,),
                in_specs=[x_spec, w1_spec, b1_spec, w2_spec, b2_spec],
                out_specs=o_spec,
            ),
            compiler_params=pltpu.CompilerParams(
                dimension_semantics=("parallel",),
                vmem_limit_bytes=_vmem_limit_bytes(blocks)),
            cost_estimate=pl.CostEstimate(
                flops=flops, transcendentals=0, bytes_accessed=base_bytes),
        )(pooled_output, w1, b1_2d, w2, b2_2d)
        return (logits,)

    # Fused-MSE path: per-tile scaled partial sums go to their own blocks, batch
    # axis stays "parallel"; the wrapper finishes the reduction over n_tiles scalars.
    t_spec = pl.BlockSpec((tb, out_dim), lambda i: (i, 0))
    part_spec = pl.BlockSpec((8, 128), lambda i: (i, 0))
    kernel = functools.partial(
        _head_loss_kernel, mxu_dtype=mxu_dtype, tb=tb, n_valid=B,
        inv_denom=1.0 / float(B * out_dim), need_row_mask=(B % tb != 0))
    logits, partials = pl.pallas_call(
        kernel,
        out_shape=(jax.ShapeDtypeStruct((B, out_dim), out_dtype),
                   jax.ShapeDtypeStruct((n_tiles * 8, 128), jnp.float32)),
        grid_spec=pltpu.PrefetchScalarGridSpec(
            num_scalar_prefetch=0,
            grid=(n_tiles,),
            in_specs=[x_spec, w1_spec, b1_spec, w2_spec, b2_spec, t_spec],
            out_specs=[o_spec, part_spec],
        ),
        compiler_params=pltpu.CompilerParams(
            dimension_semantics=("parallel",),
            vmem_limit_bytes=_vmem_limit_bytes(
                blocks + [_blk_bytes(tb, out_dim, targets.dtype), 8 * 128 * 4])),
        cost_estimate=pl.CostEstimate(
            flops=flops + 3 * B * out_dim, transcendentals=0,
            bytes_accessed=base_bytes + targets.nbytes + n_tiles * 8 * 128 * 4),
    )(pooled_output, w1, b1_2d, w2, b2_2d, targets)

    regression_loss = jnp.sum(partials[::8, 0])   # one already-scaled value per tile
    metrics = {}
    return ((regression_loss, metrics), logits)


def _init_linear(key, fan_in, fan_out, dtype=jnp.float32):
    # Deterministic init mirroring torch.nn.Linear default:
    # U(-1/sqrt(fan_in), 1/sqrt(fan_in)) for weight and bias.
    kw, kb = jax.random.split(key)
    bound = 1.0 / math.sqrt(fan_in)
    w = jax.random.uniform(kw, (fan_in, fan_out), dtype, -bound, bound)
    b = jax.random.uniform(kb, (fan_out,), dtype, -bound, bound)
    return w, b


if __name__ == "__main__":
    key = jax.random.PRNGKey(0)
    k_x, k_t, k_l1, k_l2 = jax.random.split(key, 4)

    batch, in_dim, hid_dim, out_dim = 20, 32, 64, 8

    x = jax.random.normal(k_x, (batch, in_dim), jnp.float32)
    targets = jax.random.normal(k_t, (batch, out_dim), jnp.float32)
    w1, b1 = _init_linear(k_l1, in_dim, hid_dim)
    w2, b2 = _init_linear(k_l2, hid_dim, out_dim)

    # Default tiling: two balanced tiles (16 + partial 4) -> exercises resident
    # weights, multi-tile pipelining and the last-tile row mask in the fused loss.
    (logits,) = sequence_regression_head(x, w1, b1, w2, b2)
    logits = jax.block_until_ready(logits)

    (loss, metrics), logits2 = sequence_regression_head(
        x, w1, b1, w2, b2, targets=targets)
    jax.block_until_ready((loss, logits2))

    # tb_max=8 exercises a 3-tile grid for both paths.
    (logits3,) = sequence_regression_head(x, w1, b1, w2, b2, tb_max=8)
    (loss4, _), logits4 = sequence_regression_head(
        x, w1, b1, w2, b2, targets=targets, tb_max=8)
    jax.block_until_ready((logits3, loss4, logits4))

    # Reference with identical bf16 rounding of the MXU operands.
    xb = x.astype(jnp.bfloat16).astype(jnp.float32)
    w1b = w1.astype(jnp.bfloat16).astype(jnp.float32)
    w2b = w2.astype(jnp.bfloat16).astype(jnp.float32)
    h_ref = jnp.maximum(xb @ w1b + b1, 0.0)
    ref = h_ref.astype(jnp.bfloat16).astype(jnp.float32) @ w2b + b2
    ref_loss = jnp.mean((ref - targets) ** 2)

    assert logits.shape == (batch, out_dim)
    assert logits.dtype == x.dtype
    assert jnp.allclose(logits, ref, atol=2e-3, rtol=2e-3)
    assert jnp.allclose(logits2, logits, atol=1e-5, rtol=1e-5)
    assert jnp.allclose(logits3, logits, atol=1e-5, rtol=1e-5)
    assert jnp.allclose(logits4, logits, atol=1e-5, rtol=1e-5)
    assert jnp.allclose(loss, ref_loss, atol=5e-3, rtol=5e-3)
    assert jnp.allclose(loss4, ref_loss, atol=5e-3, rtol=5e-3)
    assert metrics == {}

    print("KERNEL_OK")
</pallas_src>

<mosaic_0001>
module attributes {stable_mosaic.version = 11 : i64} {
  func.func @_head_kernel(%arg0: i32, %arg1: memref<16x32xf32, #tpu.memory_space<vmem>>, %arg2: memref<32x64xf32, #tpu.memory_space<vmem>>, %arg3: memref<1x64xf32, #tpu.memory_space<vmem>>, %arg4: memref<64x8xf32, #tpu.memory_space<vmem>>, %arg5: memref<1x8xf32, #tpu.memory_space<vmem>>, %arg6: memref<16x8xf32, #tpu.memory_space<vmem>>) attributes {dimension_semantics = [#tpu.dimension_semantics<parallel>], iteration_bounds = array<i64: 2>, scalar_prefetch = 0 : i64, scratch_operands = 0 : i64, tpu.core_type = #tpu.core_type<tc>, window_params = [{transform_indices = @transform_0, window_bounds = array<i64: 16, 32>}, {pipeline_mode = #tpu.pipeline_mode<synchronous>, transform_indices = @transform_1, window_bounds = array<i64: 32, 64>}, {pipeline_mode = #tpu.pipeline_mode<synchronous>, transform_indices = @transform_2, window_bounds = array<i64: 1, 64>}, {pipeline_mode = #tpu.pipeline_mode<synchronous>, transform_indices = @transform_3, window_bounds = array<i64: 64, 8>}, {pipeline_mode = #tpu.pipeline_mode<synchronous>, transform_indices = @transform_4, window_bounds = array<i64: 1, 8>}, {transform_indices = @transform_5, window_bounds = array<i64: 16, 8>}]} {
    %c0 = arith.constant 0 : index
    %c0_0 = arith.constant 0 : index
    %0 = vector.load %arg1[%c0, %c0_0] : memref<16x32xf32, #tpu.memory_space<vmem>>, vector<16x32xf32>
    %1 = arith.truncf %0 : vector<16x32xf32> to vector<16x32xbf16>
    %c0_1 = arith.constant 0 : index
    %c0_2 = arith.constant 0 : index
    %2 = vector.load %arg2[%c0_1, %c0_2] : memref<32x64xf32, #tpu.memory_space<vmem>>, vector<32x64xf32>
    %3 = arith.truncf %2 : vector<32x64xf32> to vector<32x64xbf16>
    %cst = arith.constant dense<0.000000e+00> : vector<16x64xf32>
    %4 = tpu.matmul %1, %3, %cst {dimension_numbers = #tpu.dot_dimension_numbers<[1], [0], [0], [1], [0, 0, 1, 1], [], []>} : vector<16x32xbf16>, vector<32x64xbf16>, vector<16x64xf32> -> vector<16x64xf32>
    %c0_3 = arith.constant 0 : index
    %c0_4 = arith.constant 0 : index
    %5 = vector.load %arg3[%c0_3, %c0_4] : memref<1x64xf32, #tpu.memory_space<vmem>>, vector<1x64xf32>
    %6 = vector.broadcast %5 : vector<1x64xf32> to vector<16x64xf32>
    %7 = arith.addf %4, %6 : vector<16x64xf32>
    %cst_5 = arith.constant 0.000000e+00 : f32
    %8 = vector.broadcast %cst_5 : f32 to vector<16x64xf32>
    %9 = arith.maximumf %7, %8 : vector<16x64xf32>
    %10 = arith.truncf %9 : vector<16x64xf32> to vector<16x64xbf16>
    %c0_6 = arith.constant 0 : index
    %c0_7 = arith.constant 0 : index
    %11 = vector.load %arg4[%c0_6, %c0_7] : memref<64x8xf32, #tpu.memory_space<vmem>>, vector<64x8xf32>
    %12 = arith.truncf %11 : vector<64x8xf32> to vector<64x8xbf16>
    %cst_8 = arith.constant dense<0.000000e+00> : vector<16x8xf32>
    %13 = tpu.matmul %10, %12, %cst_8 {dimension_numbers = #tpu.dot_dimension_numbers<[1], [0], [0], [1], [0, 0, 1, 1], [], []>} : vector<16x64xbf16>, vector<64x8xbf16>, vector<16x8xf32> -> vector<16x8xf32>
    %c0_9 = arith.constant 0 : index
    %c0_10 = arith.constant 0 : index
    %14 = vector.load %arg5[%c0_9, %c0_10] : memref<1x8xf32, #tpu.memory_space<vmem>>, vector<1x8xf32>
    %15 = vector.broadcast %14 : vector<1x8xf32> to vector<16x8xf32>
    %16 = arith.addf %13, %15 : vector<16x8xf32>
    %c0_11 = arith.constant 0 : index
    %c0_12 = arith.constant 0 : index
    %17 = vector.load %arg6[%c0_11, %c0_12] : memref<16x8xf32, #tpu.memory_space<vmem>>, vector<16x8xf32>
    tpu.vector_store %arg6[%c0_11, %c0_12], %16 {strides = array<i32>} : memref<16x8xf32, #tpu.memory_space<vmem>>, vector<16x8xf32>,
    return
  }
  func.func @transform_0(%arg0: i32) -> (i32, i32) {
    %c0_i32 = arith.constant 0 : i32
    %c0_i32_0 = arith.constant 0 : i32
    return %arg0, %c0_i32 : i32, i32
  }
  func.func @transform_1(%arg0: i32) -> (i32, i32) {
    %c0_i32 = arith.constant 0 : i32
    %c0_i32_0 = arith.constant 0 : i32
    %c0_i32_1 = arith.constant 0 : i32
    return %c0_i32, %c0_i32_0 : i32, i32
  }
  func.func @transform_2(%arg0: i32) -> (i32, i32) {
    %c0_i32 = arith.constant 0 : i32
    %c0_i32_0 = arith.constant 0 : i32
    %c0_i32_1 = arith.constant 0 : i32
    return %c0_i32, %c0_i32_0 : i32, i32
  }
  func.func @transform_3(%arg0: i32) -> (i32, i32) {
    %c0_i32 = arith.constant 0 : i32
    %c0_i32_0 = arith.constant 0 : i32
    %c0_i32_1 = arith.constant 0 : i32
    return %c0_i32, %c0_i32_0 : i32, i32
  }
  func.func @transform_4(%arg0: i32) -> (i32, i32) {
    %c0_i32 = arith.constant 0 : i32
    %c0_i32_0 = arith.constant 0 : i32
    %c0_i32_1 = arith.constant 0 : i32
    return %c0_i32, %c0_i32_0 : i32, i32
  }
  func.func @transform_5(%arg0: i32) -> (i32, i32) {
    %c0_i32 = arith.constant 0 : i32
    %c0_i32_0 = arith.constant 0 : i32
    return %arg0, %c0_i32 : i32, i32
  }
}

</mosaic_0001>

<bundles_post_ra>
// kernel: tpu_custom_call.1
= control target key start
LH: loop header
LB: loop body
LE: loop exit
PB: predicated region body
PF: predicated region fallthrough
CT: control target
= control target key end

     0   :  { %s866_s18 = smov 0   ;;  %s868_s19 = smov 0   ;;  %s991_s0 = inlined_call_operand.vmem [shape: f32[20,32], index: 0, kind: input, shape index: {}]   ;;  %s992_s1 = inlined_call_operand.vmem [shape: f32[32,64], index: 1, kind: input, shape index: {}]   ;;  %s993_s2 = inlined_call_operand.vmem [shape: f32[1,64], index: 2, kind: input, shape index: {}]   ;;  %s994_s3 = inlined_call_operand.vmem [shape: f32[64,8], index: 3, kind: input, shape index: {}]   ;;  %s995_s4 = inlined_call_operand.vmem [shape: f32[1,8], index: 4, kind: input, shape index: {}]   ;;  %s996_s5 = inlined_call_operand.vmem [shape: f32[20,8], index: 5, kind: output, shape index: {}]  }
   0x1   :  { %s870_s20 = smov 0  }
   0x2 LB: > { %s879_s21 = sadd.s32 4294967295, %s800_s20   ;;  %s881_s22 = sadd.s32 1, %s800_s20   ;;  %s800_s20 = sphi %s870_s20, %s1000_s20   ;;  %s796_s19 = sphi %s868_s19, %s999_s19   ;;  %s792_s18 = sphi %s866_s18, %s998_s18  }
   0x3   : > { %s129_s23 = ssub.s32 %s800_s20, %s881_s22  ;;  %s132_s24 = sadd.s32 1, %s796_s19 }
   0x4   : > { %p130_p0 = scmp.eq.s32.totalorder %s129_s23, 0  ;;  %p142_p1 = scmp.ne.s32.totalorder %s796_s19, %s792_s18 }
   0x5   : > { %p143_p2 = scmp.eq.s32.totalorder %s879_s21, 1  ;;  %p600_p3 = scmp.ge.s32.totalorder %s800_s20, 1 }
   0x6   : > { %s889_s25 = scalar_select %p130_p0, %s796_s19, %s132_s24  }
   0x7   : > { %p891_p4 = por %p143_p2, %p142_p1  ;;  %p196_p5 = scmp.lt.s32.totalorder %s800_s20, 3 }
   0x9   : > { %p197_p6 = pnand %p600_p3, %p196_p5 }
   0xa   : > { %v250_v0 = vld [vmem:[%s992_s1] sm:$0xff] (!%p197_p6)  ;;  %v251_v1 = vld [vmem:[%s992_s1 + $0x8] sm:$0xff] (!%p197_p6)  ;;  %v252_v2 = vld [vmem:[%s992_s1 + $0x10] sm:$0xff] (!%p197_p6)  ;;  %s905_s8 = sshll.u32 (!%p197_p6), %s879_s21, 1  ;;  %v834_v3 = vmov (!%p197_p6), 0.0   ;;  %vm835_vm0 = vmmov (!%p197_p6), 0  }
   0xb   : > { %200 = sbr.rel (%p197_p6) target bundleno = 511 (0x1ff), region = 40  ;;  %636 = vmatprep.subr.bf16.mxu0 (!%p197_p6), %v834_v3  ;;  %v254_v4 = vpack.c.bf16 (!%p197_p6), %v251_v1, %v250_v0  ;;  %v253_v5 = vld [vmem:[%s992_s1 + $0x18] sm:$0xff] (!%p197_p6)  ;;  %640 = vmatprep.mubr.msk.bf16.mxu0 (!%p197_p6), %vm835_vm0, %v834_v3  ;;  %p232_p7 = scmp.lt.s32.totalorder (!%p197_p6), %s905_s8, 2  ;;  %v311_v6 = vld [vmem:[%s994_s3] sm:$0xff] (!%p197_p6)  ;;  %v312_v7 = vld [vmem:[%s994_s3 + $0x8] sm:$0xff] (!%p197_p6)  ;;  %vm263_vm1 = vcmask (!%p197_p6), 261120  }
   0xc   : > { %644 = vmatprep.subr.bf16.mxu1 (!%p197_p6), %v834_v3  ;;  %v319_v8 = vpack.c.bf16 (!%p197_p6), %v312_v7, %v311_v6  ;;  %v313_v9 = vld [vmem:[%s994_s3 + $0x10] sm:$0xff] (!%p197_p6)  ;;  %v314_v10 = vld [vmem:[%s994_s3 + $0x18] sm:$0xff] (!%p197_p6)  ;;  %652 = vmatprep.mubr.msk.bf16.mxu1 (!%p197_p6), %vm835_vm0, %v834_v3  ;;  %v255_v11 = vpack.c.bf16 (!%p197_p6), %v253_v5, %v252_v2  ;;  %v315_v16 = vld [vmem:[%s994_s3 + $0x20] sm:$0xff] (!%p197_p6)  ;;  %vm330_vm2 = vcmask (!%p197_p6), 523264   ;;  %s224_s16 = sand.u32 (!%p197_p6), 1, %s792_s18   ;;  %vm375_vm3 = vcmask (!%p197_p6), 64512  }
   0xd   : > { %637 = vmatpush3.bf16.msra.mxu0 (!%p197_p6), %v254_v4  ;;  %v320_v12 = vpack.c.bf16 (!%p197_p6), %v314_v10, %v313_v9  ;;  %v316_v17 = vld [vmem:[%s994_s3 + $0x28] sm:$0xff] (!%p197_p6)  ;;  %v317_v19 = vld [vmem:[%s994_s3 + $0x30] sm:$0xff] (!%p197_p6)  ;;  %v318_v20 = vld [vmem:[%s994_s3 + $0x38] sm:$0xff] (!%p197_p6)  ;;  %s601_s17 = sshll.u32 (!%p197_p6), %s224_s16, 4 }
   0xe   : > { %638 = vmatprep.subr.bf16.mxu0 (!%p197_p6), %v834_v3  ;;  %645 = vmatpush3.bf16.msra.mxu1 (!%p197_p6), %v319_v8  ;;  %v321_v18 = vpack.c.bf16 (!%p197_p6), %v316_v17, %v315_v16  ;;  %v322_v21 = vpack.c.bf16 (!%p197_p6), %v318_v20, %v317_v19  ;;  %v604_v22 = vld [vmem:[%s993_s2] ss:$0 sm:$0xff] (!%p197_p6) }
   0xf   : > { %646 = vmatprep.subr.bf16.mxu1 (!%p197_p6), %v834_v3  ;;  %v606_v32 = vld [vmem:[%s995_s4] ss:$0 sm:$0xff] (!%p197_p6) }
  0x11   : > { %639 = vmatpush3.bf16.msra.mxu0 (!%p197_p6), %v255_v11 }
  0x12   : > { %s233_s23 = scalar_select %p232_p7, %s905_s8, 2  ;;  %647 = vmatpush3.bf16.msra.mxu1 %v320_v12 }
  0x13   : > { %648 = vmatprep.subr.bf16.mxu1 %v834_v3  ;;  %s386_s18 = ssub.s32 (%p891_p4), 3, %s905_s8  ;;  %s625_s27 = sshll.u32 (%p891_p4), %s879_s21, 4 }
  0x14   : > { %s603_s24 = sshll.u32 %s233_s23, 3  ;;  %p387_p8 = scmp.lt.s32.totalorder (%p891_p4), %s386_s18, 2 }
  0x15   : > { %s235_s29 = scalar_lea.vmem %s991_s0, %s603_s24  ;;  %s946_s24 = scalar_lea.vmem [#allocation2], %s601_s17  }
  0x16   : > { %v247_v13 = vld [vmem:[%s235_s29] sm:$0xff]  ;;  %v248_v14 = vld [vmem:[%s235_s29 + $0x8] sm:$0xff]  ;;  %649 = vmatpush3.bf16.msra.mxu1 %v321_v18  ;;  %s957_s30 = scalar_lea.vmem (%p891_p4), %s996_s5, %s625_s27  }
  0x17   : > { %v249_v15 = vpack.c.bf16 %v248_v14, %v247_v13  ;;  %650 = vmatprep.subr.bf16.mxu1 %v834_v3 }
  0x19   : > { %641 = vmatmul.mubr.msk.bf16.vlgmr.msra.gmra.mrb[0].mxu0 %vm263_vm1, %v249_v15 }
  0x1a   : > { %651 = vmatpush3.bf16.msra.mxu1 %v322_v21 }
  0xec   : > { %v301_v23 = vpop.f32.mrb[0].mxu0 }
  0xed   : > { %v302_v24 = vadd.f32 %v604_v22, %v301_v23  ;;  %v642_v25 = vpop.f32.mrb[1].mxu0 }
  0xee   : > { %v304_v26 = vpop.f32.mrb[2].mxu0 }
  0xef   : > { %v305_v27 = vadd.f32 %v604_v22, %v304_v26  ;;  %v643_v28 = vpop.f32.mrb[3].mxu0  ;;  %v308_v29 = vmax.f32 %v302_v24, 0.0 }
  0xf1   : > { %v309_v30 = vmax.f32 %v305_v27, 0.0 }
  0xf3   : > { %v310_v31 = vpack.c.bf16 %v309_v30, %v308_v29 }
  0xf5   : > { %653 = vmatmul.mubr.msk.bf16.vlgmr.msra.gmra.mrb[0].mxu1 %vm330_vm2, %v310_v31 }
 0x1c7   : > { %384 = sbr.rel (!%p891_p4) target bundleno = 511 (0x1ff), region = 44 }
 0x1c8   : > { %v368_v33 = vpop.f32.mrb[0].mxu1 }
 0x1c9   : > { %v369_v34 = vadd.f32 %v606_v32, %v368_v33  ;;  %v654_v35 = vpop.f32.mrb[1].mxu1 }
 0x1ca   : > { %v371_v36 = vpop.f32.mrb[2].mxu1 }
 0x1cb   : > { %376 = vst.msk [vmem:[%s946_s24] sm:$0xff] %vm375_vm3, %v369_v34  ;;  %v372_v37 = vadd.f32 %v606_v32, %v371_v36  ;;  %v655_v38 = vpop.f32.mrb[3].mxu1 }
 0x1cd   : > { %377 = vst.msk [vmem:[%s946_s24 + $0x8] sm:$0xff] %vm375_vm3, %v372_v37 }
 0x1ce   : > { %s1002_s18 = smov (!%p387_p8, %s386_s18), 2 }
 0x1cf   : > { %s610_s6 = sshll.u32 %s1002_s18, 7 }
 0x1d0   : > { %p613_p9 = scmp.eq.s32.totalorder %s610_s6, 0 }
 0x1d1   : > { %s963_s7 = sshrl.u32 (!%p613_p9), %s1002_s18, 1 }
 0x1d2   : > { %395 = sbr.rel (%p613_p9) target bundleno = 511 (0x1ff), region = 48  ;;  %p614_p10 = scmp.le.s32.totalorder (!%p613_p9), %s963_s7, 0 }
 0x1d9   : > { %553 = sbr.rel (%p614_p10) target bundleno = 490 (0x1ea), region = 124  ;;  %s802_s21 = smov (!%p614_p10), %s957_s30  }
 0x1da   : > { %s806_s26 = smov (!%p614_p10), %s946_s24   ;;  %s810_s8 = smov (!%p614_p10), 0  }
 0x1db   : > { %s814_s9 = smov (!%p614_p10), 0  }
 0x1e0 LB: >> { %v459_v39 = vld [vmem:[%s808_s26] sm:$0xff]  ;;  %v461_v40 = vld [vmem:[%s808_s26 + $0x8] sm:$0xff]  ;;  %s463_s10 = sadd.s32 1, %s812_s8  ;;  %s453_s9 = sadd.s32 1, %s816_s9   ;;  %s816_s9 = sphi %s814_s9, %s453_s9   ;;  %s812_s8 = sphi %s810_s8, %s811_s8   ;;  %s808_s26 = sphi %s806_s26, %s468_s26   ;;  %s804_s21 = sphi %s802_s21, %s469_s21  }
 0x1e1   : >> { %460 = vst [vmem:[%s804_s21] sm:$0xff] %v459_v39  ;;  %462 = vst [vmem:[%s804_s21 + $0x8] sm:$0xff] %v461_v40  ;;  %p464_p11 = scmp.ge.s32.totalorder %s463_s10, %s963_s7  ;;  %p452_p12 = scmp.ge.s32.totalorder %s453_s9, %s963_s7 }
 0x1e3   : >> { %s1004_s10 = smov (%p464_p11, %s463_s10), 0  ;;  %455 = sbr.rel (!%p452_p12) target bundleno = 480 (0x1e0), region = 130 }
 0x1e4   : >> { %s615_s11 = sshll.u32 %s1004_s10, 4  ;;  %s811_s8 = smov %s1004_s10  }
 0x1e5   : >> { %s468_s26 = scalar_lea.vmem %s946_s24, %s615_s11 [#allocation2]   ;;  %s469_s21 = scalar_lea.vmem %s957_s30, %s615_s11  }
 0x1ea PF: > { %s973_s12 = sand.u32 1, %s1002_s18   ;;  %s626_s13 = sshll.u32 %s963_s7, 4 }
 0x1eb   : > { %s474_s14 = scalar_lea.vmem %s946_s24, %s626_s13 [#allocation2]   ;;  %s476_s15 = scalar_lea.vmem %s957_s30, %s626_s13  }
 0x1ec   : > { %p620_p13 = scmp.le.s32.totalorder %s973_s12, 0 }
 0x1ed   : > { %s818_s16 = smov (!%p620_p13), %s476_s15   ;;  %s822_s17 = smov (!%p620_p13), %s474_s14  }
 0x1ee   : > { %567 = sbr.rel (%p620_p13) target bundleno = 511 (0x1ff), region = 135  ;;  %s826_s20 = smov (!%p620_p13), 0  }
 0x1ef   : > { %s830_s23 = smov (!%p620_p13), 0  }
 0x1f5 LB: >> { %v486_v41 = vld [vmem:[%s824_s17] sm:$0xff]  ;;  %s488_s18 = sadd.s32 1, %s828_s20  ;;  %s480_s23 = sadd.s32 1, %s832_s23   ;;  %s832_s23 = sphi %s830_s23, %s480_s23   ;;  %s828_s20 = sphi %s826_s20, %s827_s20   ;;  %s824_s17 = sphi %s822_s17, %s493_s17   ;;  %s820_s16 = sphi %s818_s16, %s494_s16  }
 0x1f6   : >> { %487 = vst [vmem:[%s820_s16] sm:$0xff] %v486_v41  ;;  %p489_p0 = scmp.ge.s32.totalorder %s488_s18, %s973_s12  ;;  %p479_p1 = scmp.ge.s32.totalorder %s480_s23, %s973_s12 }
 0x1f8   : >> { %s1006_s18 = smov (%p489_p0, %s488_s18), 0  ;;  %482 = sbr.rel (!%p479_p1) target bundleno = 501 (0x1f5), region = 141 }
 0x1f9   : >> { %s621_s24 = sshll.u32 %s1006_s18, 3  ;;  %s827_s20 = smov %s1006_s18  }
 0x1fa   : >> { %s493_s17 = scalar_lea.vmem %s474_s14, %s621_s24 [#allocation2]   ;;  %s494_s16 = scalar_lea.vmem %s476_s15, %s621_s24  }
 0x1ff PF: > { %p12_p2 = scmp.ge.s32.totalorder %s881_s22, 4   ;;  %s998_s18 = smov %s796_s19 }
 0x200   : > { %s999_s19 = smov %s889_s25  ;;  %s1000_s20 = smov %s881_s22 }
 0x201   :  { %14 = sbr.rel (!%p12_p2) target bundleno = 2 (0x2), region = 152 }

</bundles_post_ra>
